<compile_context>
chip_gen: v7x
topology: tpu7x:2x2x1
jax: 0.10.0
libtpu: 0.0.40
codegen_flags: <defaults>
</compile_context>

<pallas_src>
import functools

import jax
import jax.numpy as jnp
from jax.experimental import pallas as pl
from jax.experimental.pallas import tpu as pltpu


def _normalize_kernel(x_ref, scale_ref, bias_ref, o_ref, *, tr, row_axis):
    """o = x * scale[row] + bias[row]; f32 math, cast on store."""
    i = pl.program_id(row_axis)
    r0 = pl.multiple_of(i * tr, 8)
    scale = scale_ref[pl.ds(r0, tr), :]     # (tr, 1), VMEM-resident params
    bias = bias_ref[pl.ds(r0, tr), :]
    x = x_ref[...].astype(jnp.float32)
    o_ref[...] = (x * scale + bias).astype(o_ref.dtype)


def _vmem_capacity_bytes():
    try:
        return int(pltpu.get_tpu_info().vmem_capacity_bytes)
    except Exception:
        return 64 << 20      # conservative (v7x-sized) fallback


def _pick_tiles(rows, lanes, itemsize):
    """Lane-dense, generation-gated tiles.

    Prefers full-lane tiles (tl == lanes) so each tile DMA is one contiguous
    HBM run. Block dims are (8,128)-divisible or equal to the full array dim.
    Returns (tr, tl, vmem_limit_bytes).
    """
    if _vmem_capacity_bytes() >= (96 << 20):   # v5e / v6e: 128 MiB physical VMEM
        tile_bytes, vmem_limit = 8 << 20, 64 << 20
    else:                                      # v7x: 64 MiB per TensorCore
        tile_bytes, vmem_limit = 4 << 20, 48 << 20
    elem_budget = max(tile_bytes // max(itemsize, 1), 8 * 128)

    # Preferred path: full-lane tiles (contiguous DMA, no masked lane edges).
    tr_full = elem_budget // lanes if lanes <= elem_budget else 0
    if tr_full >= 8 or (tr_full >= 1 and rows <= tr_full):
        tl = lanes
        tr = rows if rows <= tr_full else (tr_full // 8) * 8
        return tr, tl, vmem_limit

    # Very large H*W: tile the lane dim too (multiple of 128, long runs).
    tr = rows if rows < 8 else 8
    tl = max(128, (elem_budget // max(tr, 1) // 128) * 128)
    tl = min(tl, max(128, (lanes // 128) * 128))
    return tr, tl, vmem_limit


def prob_transform(x_nchw, mean, std, key=None, p=1.0):
    """Pallas implementation of ProbTransform(f=Normalize(mean, std), p=p).

    The Bernoulli(p) decision is host-side (like `random.random() < p`), so
    the miss path returns x with zero device work (no lax.cond copy).
    """
    p = float(p)
    if p >= 1.0:
        take = True
    elif p <= 0.0:
        take = False
    else:
        # Host-side Bernoulli draw mirroring the reference's host RNG.
        # (Forces a sync; matches the PyTorch module's Python-level branch.)
        take = bool(jax.random.uniform(key, ()) < p)
    if not take:
        return x_nchw                          # truly free miss path

    N, C, H, W = x_nchw.shape
    rows, lanes = N * C, H * W
    x2d = x_nchw.reshape(rows, lanes)

    # Normalize produces floats; promote integer images (e.g. uint8) to f32.
    out_dtype = x2d.dtype if jnp.issubdtype(x2d.dtype, jnp.floating) else jnp.float32

    # Per-channel affine params in f32: f(x) = x * (1/std) + (-mean/std).
    inv_std = 1.0 / std.astype(jnp.float32)
    scale = jnp.tile(inv_std, (N,)).reshape(rows, 1)
    bias = jnp.tile(-mean.astype(jnp.float32) * inv_std, (N,)).reshape(rows, 1)

    itemsize = max(x2d.dtype.itemsize, jnp.dtype(out_dtype).itemsize)
    tr, tl, vmem_limit = _pick_tiles(rows, lanes, itemsize)
    gr, gl = pl.cdiv(rows, tr), pl.cdiv(lanes, tl)

    # Pad params so in-kernel row slices on a ragged last row-tile stay
    # in-bounds (padded rows are never stored back for x).
    pad = gr * tr - rows
    if pad:
        scale = jnp.concatenate([scale, jnp.ones((pad, 1), jnp.float32)], axis=0)
        bias = jnp.concatenate([bias, jnp.zeros((pad, 1), jnp.float32)], axis=0)

    # Leading grid axis = the one with more tiles, so v7x's two TensorCores
    # get a balanced "parallel" split. No effect on single-TC v5e/v6e.
    if gr >= gl:
        grid, x_idx, row_axis = (gr, gl), (lambda i, j: (i, j)), 0
    else:
        grid, x_idx, row_axis = (gl, gr), (lambda i, j: (j, i)), 1

    kernel = functools.partial(_normalize_kernel, tr=tr, row_axis=row_axis)
    out2d = pl.pallas_call(
        kernel,
        out_shape=jax.ShapeDtypeStruct((rows, lanes), out_dtype),
        grid=grid,
        in_specs=[
            pl.BlockSpec((tr, tl), x_idx),
            # Tiny (rows, 1) params stay whole-array resident in VMEM; the
            # kernel slices the row block it needs (no per-step param DMAs).
            pl.BlockSpec(memory_space=pltpu.MemorySpace.VMEM),
            pl.BlockSpec(memory_space=pltpu.MemorySpace.VMEM),
        ],
        out_specs=pl.BlockSpec((tr, tl), x_idx),
        compiler_params=pltpu.CompilerParams(
            dimension_semantics=("parallel", "parallel"),
            vmem_limit_bytes=vmem_limit,
        ),
    )(x2d, scale, bias)
    return out2d.reshape(N, C, H, W)


if __name__ == "__main__":
    # TODO(synk): `f` is an arbitrary callable in the PyTorch module; a concrete
    # per-channel normalize is used here as the representative transform.
    key = jax.random.PRNGKey(0)
    kx, kflag = jax.random.split(key)

    N, C, H, W = 2, 4, 16, 16
    x = jax.random.uniform(kx, (N, C, H, W), dtype=jnp.float32)
    mean = jnp.array([0.1, 0.2, 0.3, 0.4], dtype=jnp.float32)
    std = jnp.array([0.5, 0.6, 0.7, 0.8], dtype=jnp.float32)

    # p = 1.0 (module default): f is always applied.
    out = jax.block_until_ready(prob_transform(x, mean, std, kflag, p=1.0))
    expected = (x - mean[None, :, None, None]) / std[None, :, None, None]
    assert out.shape == x.shape and out.dtype == x.dtype
    assert jnp.allclose(out, expected, atol=1e-5, rtol=1e-5)

    # p = 0.0: identity path (host-side branch; kernel skipped, no copy).
    out_id = jax.block_until_ready(prob_transform(x, mean, std, kflag, p=0.0))
    assert out_id is x or jnp.array_equal(out_id, x)

    print("KERNEL_OK")
</pallas_src>

<mosaic_0001>
module attributes {stable_mosaic.version = 11 : i64} {
  func.func @_normalize_kernel(%arg0: i32, %arg1: i32, %arg2: memref<8x256xf32, #tpu.memory_space<vmem>>, %arg3: memref<8x1xf32, #tpu.memory_space<vmem>>, %arg4: memref<8x1xf32, #tpu.memory_space<vmem>>, %arg5: memref<8x256xf32, #tpu.memory_space<vmem>>) attributes {dimension_semantics = [#tpu.dimension_semantics<parallel>, #tpu.dimension_semantics<parallel>], iteration_bounds = array<i64: 1, 1>, scalar_prefetch = 0 : i64, scratch_operands = 0 : i64, tpu.core_type = #tpu.core_type<tc>, window_params = [{transform_indices = @transform_0, window_bounds = array<i64: 8, 256>}, {pipeline_mode = #tpu.pipeline_mode<synchronous>, transform_indices = @transform_1, window_bounds = array<i64: 8, 1>}, {pipeline_mode = #tpu.pipeline_mode<synchronous>, transform_indices = @transform_2, window_bounds = array<i64: 8, 1>}, {transform_indices = @transform_3, window_bounds = array<i64: 8, 256>}]} {
    %c8_i32 = arith.constant 8 : i32
    %0 = arith.muli %arg0, %c8_i32 : i32
    %1 = tpu.assume_multiple %0, 8 : i32
    %2 = arith.index_cast %1 : i32 to index
    %c0 = arith.constant 0 : index
    %3 = vector.load %arg3[%2, %c0] : memref<8x1xf32, #tpu.memory_space<vmem>>, vector<8x1xf32>
    %4 = arith.index_cast %1 : i32 to index
    %c0_0 = arith.constant 0 : index
    %5 = vector.load %arg4[%4, %c0_0] : memref<8x1xf32, #tpu.memory_space<vmem>>, vector<8x1xf32>
    %c0_1 = arith.constant 0 : index
    %c0_2 = arith.constant 0 : index
    %6 = vector.load %arg2[%c0_1, %c0_2] : memref<8x256xf32, #tpu.memory_space<vmem>>, vector<8x256xf32>
    %7 = vector.broadcast %3 : vector<8x1xf32> to vector<8x256xf32>
    %8 = arith.mulf %6, %7 : vector<8x256xf32>
    %9 = vector.broadcast %5 : vector<8x1xf32> to vector<8x256xf32>
    %10 = arith.addf %8, %9 : vector<8x256xf32>
    %c0_3 = arith.constant 0 : index
    %c0_4 = arith.constant 0 : index
    %11 = vector.load %arg5[%c0_3, %c0_4] : memref<8x256xf32, #tpu.memory_space<vmem>>, vector<8x256xf32>
    tpu.vector_store %arg5[%c0_3, %c0_4], %10 {strides = array<i32>} : memref<8x256xf32, #tpu.memory_space<vmem>>, vector<8x256xf32>,
    return
  }
  func.func @transform_0(%arg0: i32, %arg1: i32) -> (i32, i32) {
    %c0_i32 = arith.constant 0 : i32
    return %arg0, %arg1 : i32, i32
  }
  func.func @transform_1(%arg0: i32, %arg1: i32) -> (i32, i32) {
    %c0_i32 = arith.constant 0 : i32
    %c0_i32_0 = arith.constant 0 : i32
    %c0_i32_1 = arith.constant 0 : i32
    return %c0_i32, %c0_i32_0 : i32, i32
  }
  func.func @transform_2(%arg0: i32, %arg1: i32) -> (i32, i32) {
    %c0_i32 = arith.constant 0 : i32
    %c0_i32_0 = arith.constant 0 : i32
    %c0_i32_1 = arith.constant 0 : i32
    return %c0_i32, %c0_i32_0 : i32, i32
  }
  func.func @transform_3(%arg0: i32, %arg1: i32) -> (i32, i32) {
    %c0_i32 = arith.constant 0 : i32
    return %arg0, %arg1 : i32, i32
  }
}

</mosaic_0001>

<bundles_post_ra>
// kernel: tpu_custom_call.1
= control target key start
LH: loop header
LB: loop body
LE: loop exit
PB: predicated region body
PF: predicated region fallthrough
CT: control target
= control target key end

     0   :  { %v79_v1 = vmov 0   ;;  %s125_s0 = inlined_call_operand.vmem [shape: f32[8,256], index: 0, kind: input, shape index: {}]   ;;  %s126_s1 = inlined_call_operand.vmem [shape: f32[8,1], index: 1, kind: input, shape index: {}]   ;;  %s127_s2 = inlined_call_operand.vmem [shape: f32[8,1], index: 2, kind: input, shape index: {}]   ;;  %s128_s3 = inlined_call_operand.hbm [shape: f32[8,256], index: 3, kind: output, shape index: {}]  }
   0x1   :  { %v17_v0 = vld [vmem:[%s126_s1] sm:$0xff]  ;;  %54 = vset.pattern.permute.xlu0 %v79_v1 }
   0x2   :  { %8 = vsyncpa [#allocation3], 0  ;;  %24 = vperm.xlu0 %54, %v17_v0   ;;  %v19_v2 = vld [vmem:[%s127_s2] sm:$0xff]  ;;  %v21_v4 = vld [vmem:[%s125_s0 + $0x8] sm:$0xff]  ;;  %s80_s20 = smov [#allocation2]  }
   0x3   :  { %v20_v3 = vld [vmem:[%s125_s0] sm:$0xff]  ;;  %s44_s1 = sshll.u32 %s80_s20, 4  ;;  %s45_s1 = int_to_ptr.vmem [resolvable:$true] %s44_s1 }
   0x4   :  { %s55_s2 = scalar_lea.vmem %s45_s1, 256  ;;  %p60_p1 = scmp.lt.s32.totalorder %s45_s1, %s45_s1 }
   0x5   :  { %p56_p0 = scmp.ne.s32.totalorder %s45_s1, %s55_s2  ;;  %p61_p2 = scmp.lt.s32.totalorder %s55_s2, %s55_s2 }
   0x6   :  { %31 = vperm.xlu0 %54, %v19_v2  }
   0x7   :  { %p62_p3 = por %p61_p2, %p60_p1 }
   0x9   :  { %p63_p4 = pnand %p62_p3, %p56_p0 }
  0x81   :  { %v25_v5 = vpop.permute.xlu0 %24 }
  0x82   :  { %v27_v6 = vmul.f32 %v25_v5, %v20_v3  ;;  %v28_v7 = vmul.f32 %v25_v5, %v21_v4 }
  0x85   :  { %v32_v8 = vpop.permute.xlu0 %31 }
  0x86   :  { %v34_v9 = vadd.f32 %v32_v8, %v27_v6  ;;  %v35_v10 = vadd.f32 %v32_v8, %v28_v7 }
  0x88   :  { %36 = vst [vmem:[#allocation2] sm:$0xff] %v34_v9  ;;  %37 = vst [vmem:[#allocation2 + $0x8] sm:$0xff] %v35_v10 }
  0x89   :  { %66 = shalt.err (!%p63_p4)
}
  0x8a   :  { %s67_s22 = scalar_lea.hbm %s128_s3, 256 }
  0x8b   :  { %p68_p5 = scmp.ne.s32.totalorder %s128_s3, %s67_s22  ;;  %p71_p6 = scmp.lt.u32.totalorder %s67_s22, %s128_s3 }
  0x8d   :  { %p73_p7 = pnand %p71_p6, %p68_p5 }
  0x8f   :  { %76 = shalt.err (!%p73_p7)
}
  0x90   :  { %47 = dma.vmem_to_hbm [thread:$0]  %s45_s1, 256, %s128_s3, [#allocation3]  }
  0x91   :  { %77 = dma.done.wait [#allocation3], 256  }
  0x92   :  { %78 = vsyncadd [#allocation3], 4294967040 }
  0x93   :  { %51 = vsyncpa [#allocation3], 1 }

</bundles_post_ra>
